<compile_context>
chip_gen: v7x
topology: tpu7x:2x2x1
jax: 0.10.0
libtpu: 0.0.40
codegen_flags: <defaults>
</compile_context>

<pallas_src>
import jax
import jax.numpy as jnp
from jax.experimental import pallas as pl
from jax.experimental.pallas import tpu as pltpu


def _round_up(x, m):
    return ((x + m - 1) // m) * m


def phi_kernel(x_ref, w1_ref, w2_ref, w3_ref, b_ref, o_ref):
    # x_ref: (tb, 16) -- 4 set elements (4 features each) packed along lanes.
    # Block-diagonal weights apply the same per-element MLP to all 4 groups,
    # keeping every load/store and every intermediate lane-dense.
    # Layer 1: (tb, 16) @ (16, 64) + b1 (tiled x4), ReLU
    h = jnp.dot(x_ref[...], w1_ref[...], preferred_element_type=jnp.float32)
    h = jnp.maximum(h + b_ref[0:1, 0:64], 0.0)
    # Layer 2: (tb, 64) @ (64, 128) + b2 (tiled x4), ReLU
    h = jnp.dot(h, w2_ref[...], preferred_element_type=jnp.float32)
    h = jnp.maximum(h + b_ref[1:2, :], 0.0)
    # Layer 3: (tb, 128) @ (128, 128) + b3 (tiled x4)
    h = jnp.dot(h, w3_ref[...], preferred_element_type=jnp.float32)
    o_ref[...] = (h + b_ref[2:3, :]).astype(o_ref.dtype)


def pack_phi_params(params):
    """Build block-diagonal (4-group) weights and one packed bias operand."""
    w1t, b1 = params["w1t"], params["b1"]   # (4, 16), (1, 16)
    w2t, b2 = params["w2t"], params["b2"]   # (16, 32), (1, 32)
    w3t, b3 = params["w3t"], params["b3"]   # (32, 32), (1, 32)
    eye4 = jnp.eye(4, dtype=jnp.float32)
    w1b = jnp.kron(eye4, w1t.astype(jnp.float32))   # (16, 64)
    w2b = jnp.kron(eye4, w2t.astype(jnp.float32))   # (64, 128)
    w3b = jnp.kron(eye4, w3t.astype(jnp.float32))   # (128, 128)
    bias = jnp.zeros((3, 128), jnp.float32)
    bias = bias.at[0, :64].set(jnp.tile(b1.reshape(-1), 4))
    bias = bias.at[1, :].set(jnp.tile(b2.reshape(-1), 4))
    bias = bias.at[2, :].set(jnp.tile(b3.reshape(-1), 4))
    return w1b, w2b, w3b, bias


def phi_forward(x, params, *, tile_rows=2048):
    """Apply Phi to the last dim of x (shape (..., 4)) -> (..., 32).

    tile_rows = slab rows per grid step; each slab row holds 4 set elements,
    so the default processes 8192 elements / step.
    """
    orig_shape = x.shape
    assert orig_shape[-1] == 4, "Phi expects 4 input features"
    x2 = x.reshape(-1, 4).astype(jnp.float32)
    n = x2.shape[0]

    w1b, w2b, w3b, bias = pack_phi_params(params)

    # Slab layout: 4 consecutive elements per 128-lane-friendly row.
    n_slab = -(-n // 4)
    tb = min(int(tile_rows), _round_up(max(n_slab, 1), 8))
    # Keep >= 2 grid steps when there is enough work (v7x: 2 TensorCores).
    if n_slab > 8 and _round_up(n_slab, tb) // tb < 2:
        tb = max(8, _round_up(-(-n_slab // 2), 8))
    n_slab_pad = _round_up(n_slab, tb)
    n_pad = 4 * n_slab_pad
    if n_pad != n:
        x2 = jnp.pad(x2, ((0, n_pad - n), (0, 0)))
    x_slab = x2.reshape(n_slab_pad, 16)

    grid = (n_slab_pad // tb,)

    def full(arr):
        # Small resident operands: whole array every step (block index 0).
        return pl.BlockSpec(arr.shape, lambda i: (0, 0))

    out_slab = pl.pallas_call(
        phi_kernel,
        out_shape=jax.ShapeDtypeStruct((n_slab_pad, 128), jnp.float32),
        grid_spec=pltpu.PrefetchScalarGridSpec(
            num_scalar_prefetch=0,
            grid=grid,
            in_specs=[
                pl.BlockSpec((tb, 16), lambda i: (i, 0)),   # x slab tile
                full(w1b), full(w2b), full(w3b), full(bias),
            ],
            out_specs=pl.BlockSpec((tb, 128), lambda i: (i, 0)),
        ),
        compiler_params=pltpu.CompilerParams(
            dimension_semantics=("parallel",)),
    )(x_slab, w1b, w2b, w3b, bias)

    out = out_slab.reshape(n_pad, 32)[:n]
    return out.reshape(orig_shape[:-1] + (32,))


def init_params(key):
    """Deterministic init mimicking PyTorch Linear default (uniform +-1/sqrt(fan_in))."""
    def linear(key, fan_in, fan_out):
        kw, kb = jax.random.split(key)
        bound = 1.0 / jnp.sqrt(fan_in)
        # PyTorch stores W as (out, in); keep the transposed (in, out) copy
        # since the kernel computes x @ W.T.
        w = jax.random.uniform(kw, (fan_out, fan_in), jnp.float32, -bound, bound)
        b = jax.random.uniform(kb, (fan_out,), jnp.float32, -bound, bound)
        return w.T, b.reshape(1, fan_out)

    k1, k2, k3 = jax.random.split(key, 3)
    w1t, b1 = linear(k1, 4, 16)
    w2t, b2 = linear(k2, 16, 32)
    w3t, b3 = linear(k3, 32, 32)
    return {"w1t": w1t, "b1": b1, "w2t": w2t, "b2": b2, "w3t": w3t, "b3": b3}


def phi_reference(x, params):
    h = jnp.maximum(x @ params["w1t"] + params["b1"], 0.0)
    h = jnp.maximum(h @ params["w2t"] + params["b2"], 0.0)
    return h @ params["w3t"] + params["b3"]


if __name__ == "__main__":
    key = jax.random.PRNGKey(0)
    kx, kp = jax.random.split(key)

    # Deep Sets "phi" is applied per set element: small example (batch=2, set=4, feat=4).
    x = jax.random.normal(kx, (2, 4, 4), jnp.float32)
    params = init_params(kp)

    out = phi_forward(x, params)
    out = jax.block_until_ready(out)

    ref = phi_reference(x, params)
    assert out.shape == (2, 4, 32)
    assert jnp.allclose(out, ref, atol=1e-5, rtol=1e-5)

    print("KERNEL_OK")
</pallas_src>

<mosaic_0001>
module attributes {stable_mosaic.version = 11 : i64} {
  func.func @phi_kernel(%arg0: i32, %arg1: memref<8x16xf32, #tpu.memory_space<vmem>>, %arg2: memref<16x64xf32, #tpu.memory_space<vmem>>, %arg3: memref<64x128xf32, #tpu.memory_space<vmem>>, %arg4: memref<128x128xf32, #tpu.memory_space<vmem>>, %arg5: memref<3x128xf32, #tpu.memory_space<vmem>>, %arg6: memref<8x128xf32, #tpu.memory_space<vmem>>) attributes {dimension_semantics = [#tpu.dimension_semantics<parallel>], iteration_bounds = array<i64: 1>, scalar_prefetch = 0 : i64, scratch_operands = 0 : i64, tpu.core_type = #tpu.core_type<tc>, window_params = [{transform_indices = @transform_0, window_bounds = array<i64: 8, 16>}, {pipeline_mode = #tpu.pipeline_mode<synchronous>, transform_indices = @transform_1, window_bounds = array<i64: 16, 64>}, {pipeline_mode = #tpu.pipeline_mode<synchronous>, transform_indices = @transform_2, window_bounds = array<i64: 64, 128>}, {pipeline_mode = #tpu.pipeline_mode<synchronous>, transform_indices = @transform_3, window_bounds = array<i64: 128, 128>}, {pipeline_mode = #tpu.pipeline_mode<synchronous>, transform_indices = @transform_4, window_bounds = array<i64: 3, 128>}, {transform_indices = @transform_5, window_bounds = array<i64: 8, 128>}]} {
    %c0 = arith.constant 0 : index
    %c0_0 = arith.constant 0 : index
    %0 = vector.load %arg1[%c0, %c0_0] : memref<8x16xf32, #tpu.memory_space<vmem>>, vector<8x16xf32>
    %c0_1 = arith.constant 0 : index
    %c0_2 = arith.constant 0 : index
    %1 = vector.load %arg2[%c0_1, %c0_2] : memref<16x64xf32, #tpu.memory_space<vmem>>, vector<16x64xf32>
    %cst = arith.constant dense<0.000000e+00> : vector<8x64xf32>
    %2 = tpu.matmul %0, %1, %cst {dimension_numbers = #tpu.dot_dimension_numbers<[1], [0], [0], [1], [0, 0, 1, 1], [], []>} : vector<8x16xf32>, vector<16x64xf32>, vector<8x64xf32> -> vector<8x64xf32>
    %c0_3 = arith.constant 0 : index
    %c0_4 = arith.constant 0 : index
    %3 = vector.load %arg5[%c0_3, %c0_4] : memref<3x128xf32, #tpu.memory_space<vmem>>, vector<1x64xf32>
    %4 = vector.broadcast %3 : vector<1x64xf32> to vector<8x64xf32>
    %5 = arith.addf %2, %4 : vector<8x64xf32>
    %cst_5 = arith.constant 0.000000e+00 : f32
    %6 = vector.broadcast %cst_5 : f32 to vector<8x64xf32>
    %7 = arith.maximumf %5, %6 : vector<8x64xf32>
    %c0_6 = arith.constant 0 : index
    %c0_7 = arith.constant 0 : index
    %8 = vector.load %arg3[%c0_6, %c0_7] : memref<64x128xf32, #tpu.memory_space<vmem>>, vector<64x128xf32>
    %cst_8 = arith.constant dense<0.000000e+00> : vector<8x128xf32>
    %9 = tpu.matmul %7, %8, %cst_8 {dimension_numbers = #tpu.dot_dimension_numbers<[1], [0], [0], [1], [0, 0, 1, 1], [], []>} : vector<8x64xf32>, vector<64x128xf32>, vector<8x128xf32> -> vector<8x128xf32>
    %c1 = arith.constant 1 : index
    %c0_9 = arith.constant 0 : index
    %10 = vector.load %arg5[%c1, %c0_9] : memref<3x128xf32, #tpu.memory_space<vmem>>, vector<1x128xf32>
    %11 = vector.broadcast %10 : vector<1x128xf32> to vector<8x128xf32>
    %12 = arith.addf %9, %11 : vector<8x128xf32>
    %cst_10 = arith.constant 0.000000e+00 : f32
    %13 = vector.broadcast %cst_10 : f32 to vector<8x128xf32>
    %14 = arith.maximumf %12, %13 : vector<8x128xf32>
    %c0_11 = arith.constant 0 : index
    %c0_12 = arith.constant 0 : index
    %15 = vector.load %arg4[%c0_11, %c0_12] : memref<128x128xf32, #tpu.memory_space<vmem>>, vector<128x128xf32>
    %cst_13 = arith.constant dense<0.000000e+00> : vector<8x128xf32>
    %16 = tpu.matmul %14, %15, %cst_13 {dimension_numbers = #tpu.dot_dimension_numbers<[1], [0], [0], [1], [0, 0, 1, 1], [], []>} : vector<8x128xf32>, vector<128x128xf32>, vector<8x128xf32> -> vector<8x128xf32>
    %c2 = arith.constant 2 : index
    %c0_14 = arith.constant 0 : index
    %17 = vector.load %arg5[%c2, %c0_14] : memref<3x128xf32, #tpu.memory_space<vmem>>, vector<1x128xf32>
    %18 = vector.broadcast %17 : vector<1x128xf32> to vector<8x128xf32>
    %19 = arith.addf %16, %18 : vector<8x128xf32>
    %c0_15 = arith.constant 0 : index
    %c0_16 = arith.constant 0 : index
    %20 = vector.load %arg6[%c0_15, %c0_16] : memref<8x128xf32, #tpu.memory_space<vmem>>, vector<8x128xf32>
    tpu.vector_store %arg6[%c0_15, %c0_16], %19 {strides = array<i32>} : memref<8x128xf32, #tpu.memory_space<vmem>>, vector<8x128xf32>,
    return
  }
  func.func @transform_0(%arg0: i32) -> (i32, i32) {
    %c0_i32 = arith.constant 0 : i32
    %c0_i32_0 = arith.constant 0 : i32
    return %arg0, %c0_i32 : i32, i32
  }
  func.func @transform_1(%arg0: i32) -> (i32, i32) {
    %c0_i32 = arith.constant 0 : i32
    %c0_i32_0 = arith.constant 0 : i32
    %c0_i32_1 = arith.constant 0 : i32
    return %c0_i32, %c0_i32_0 : i32, i32
  }
  func.func @transform_2(%arg0: i32) -> (i32, i32) {
    %c0_i32 = arith.constant 0 : i32
    %c0_i32_0 = arith.constant 0 : i32
    %c0_i32_1 = arith.constant 0 : i32
    return %c0_i32, %c0_i32_0 : i32, i32
  }
  func.func @transform_3(%arg0: i32) -> (i32, i32) {
    %c0_i32 = arith.constant 0 : i32
    %c0_i32_0 = arith.constant 0 : i32
    %c0_i32_1 = arith.constant 0 : i32
    return %c0_i32, %c0_i32_0 : i32, i32
  }
  func.func @transform_4(%arg0: i32) -> (i32, i32) {
    %c0_i32 = arith.constant 0 : i32
    %c0_i32_0 = arith.constant 0 : i32
    %c0_i32_1 = arith.constant 0 : i32
    return %c0_i32, %c0_i32_0 : i32, i32
  }
  func.func @transform_5(%arg0: i32) -> (i32, i32) {
    %c0_i32 = arith.constant 0 : i32
    %c0_i32_0 = arith.constant 0 : i32
    return %arg0, %c0_i32 : i32, i32
  }
}

</mosaic_0001>

<bundles_post_ra>
// kernel: tpu_custom_call.1
= control target key start
LH: loop header
LB: loop body
LE: loop exit
PB: predicated region body
PF: predicated region fallthrough
CT: control target
= control target key end

     0   :  { %10 = vsyncpa [#allocation3], 0  ;;  %s750_s0 = inlined_call_operand.hbm [shape: f32[8,16], index: 0, kind: input, shape index: {}]   ;;  %s751_s1 = inlined_call_operand.hbm [shape: f32[16,64], index: 1, kind: input, shape index: {}]   ;;  %s752_s2 = inlined_call_operand.hbm [shape: f32[64,128], index: 2, kind: input, shape index: {}]   ;;  %s753_s3 = inlined_call_operand.hbm [shape: f32[128,128], index: 3, kind: input, shape index: {}]   ;;  %s754_s4 = inlined_call_operand.vmem [shape: f32[3,128], index: 4, kind: input, shape index: {}]   ;;  %s755_s5 = inlined_call_operand.hbm [shape: f32[8,128], index: 5, kind: output, shape index: {}]  }
   0x1   :  { %11 = vsyncpa [#allocation6], 0 }
   0x2   :  { %12 = vsyncpa [#allocation9], 0 }
   0x3   :  { %13 = vsyncpa [#allocation4], 0  ;;  %s616_s18 = smov [#allocation5]   ;;  %s498_s22 = scalar_lea.hbm %s751_s1, 256 }
   0x4   :  { %s29_s19 = sshll.u32 %s616_s18, 4  ;;  %p499_p0 = scmp.ne.s32.totalorder %s751_s1, %s498_s22  ;;  %s30_s19 = int_to_ptr.vmem [resolvable:$true] %s29_s19 }
   0x5   :  { %p502_p1 = scmp.lt.u32.totalorder %s498_s22, %s751_s1 }
   0x7   :  { %p504_p2 = pnand %p502_p1, %p499_p0 }
   0x9   :  { %507 = shalt.err (!%p504_p2)
}
   0xa   :  { %s508_s27 = scalar_lea.vmem %s30_s19, 256  ;;  %p513_p4 = scmp.lt.s32.totalorder %s30_s19, %s30_s19 }
   0xb   :  { %p509_p3 = scmp.ne.s32.totalorder %s30_s19, %s508_s27  ;;  %p514_p5 = scmp.lt.s32.totalorder %s508_s27, %s508_s27 }
   0xd   :  { %p515_p6 = por %p514_p5, %p513_p4 }
   0xf   :  { %p516_p7 = pnand %p515_p6, %p509_p3 }
  0x11   :  { %519 = shalt.err (!%p516_p7)
}
  0x12   :  { %s617_s28 = smov 128   ;;  %s618_s29 = smov 8  }
  0x13   :  { %35 = dma.hbm_to_vmem [thread:$0]  %s751_s1, 256, %s30_s19, [#allocation6], %s617_s28, %s617_s28, %s618_s29  }
  0x14   :  { %s619_s7 = smov [#allocation2]   ;;  %s620_s9 = smov [#allocation7]  }
  0x15   :  { %s20_s8 = sshll.u32 %s619_s7, 4  ;;  %s41_s10 = sshll.u32 %s620_s9, 4  ;;  %s21_s8 = int_to_ptr.vmem [resolvable:$true] %s20_s8  ;;  %s42_s10 = int_to_ptr.vmem [resolvable:$true] %s41_s10 }
  0x16   :  { %s520_s13 = scalar_lea.hbm %s750_s0, 128 }
  0x17   :  { %p521_p8 = scmp.ne.s32.totalorder %s750_s0, %s520_s13  ;;  %p524_p9 = scmp.lt.u32.totalorder %s520_s13, %s750_s0 }
  0x19   :  { %p526_p10 = pnand %p524_p9, %p521_p8 }
  0x1b   :  { %529 = shalt.err (!%p526_p10)
}
  0x1c   :  { %s530_s1 = scalar_lea.vmem %s21_s8, 128  ;;  %p535_p12 = scmp.lt.s32.totalorder %s21_s8, %s21_s8 }
  0x1d   :  { %p531_p11 = scmp.ne.s32.totalorder %s21_s8, %s530_s1  ;;  %p536_p13 = scmp.lt.s32.totalorder %s530_s1, %s530_s1 }
  0x1f   :  { %p537_p0 = por %p536_p13, %p535_p12 }
  0x21   :  { %p538_p1 = pnand %p537_p0, %p531_p11 }
  0x23   :  { %541 = shalt.err (!%p538_p1)
}
  0x24   :  { %23 = dma.hbm_to_vmem [thread:$0]  %s750_s0, 128, %s21_s8, [#allocation3]  }
  0x25   :  { %s542_s22 = scalar_lea.hbm %s752_s2, 1024 }
  0x26   :  { %p543_p2 = scmp.ne.s32.totalorder %s752_s2, %s542_s22  ;;  %p546_p3 = scmp.lt.u32.totalorder %s542_s22, %s752_s2 }
  0x28   :  { %p548_p4 = pnand %p546_p3, %p543_p2 }
  0x2a   :  { %551 = shalt.err (!%p548_p4)
}
  0x2b   :  { %s552_s27 = scalar_lea.vmem %s42_s10, 1024  ;;  %p557_p6 = scmp.lt.s32.totalorder %s42_s10, %s42_s10 }
  0x2c   :  { %p553_p5 = scmp.ne.s32.totalorder %s42_s10, %s552_s27  ;;  %p558_p7 = scmp.lt.s32.totalorder %s552_s27, %s552_s27 }
  0x2e   :  { %p559_p8 = por %p558_p7, %p557_p6 }
  0x30   :  { %p560_p9 = pnand %p559_p8, %p553_p5 }
  0x32   :  { %563 = shalt.err (!%p560_p9)
}
  0x33   :  { %47 = dma.hbm_to_vmem [thread:$0]  %s752_s2, 1024, %s42_s10, [#allocation6], %s617_s28, %s617_s28, %s618_s29  }
  0x34   :  { %s621_s6 = smov [#allocation8]   ;;  %s564_s11 = scalar_lea.hbm %s753_s3, 2048 }
  0x35   :  { %s53_s7 = sshll.u32 %s621_s6, 4  ;;  %p565_p10 = scmp.ne.s32.totalorder %s753_s3, %s564_s11  ;;  %s54_s7 = int_to_ptr.vmem [resolvable:$true] %s53_s7 }
  0x36   :  { %p568_p11 = scmp.lt.u32.totalorder %s564_s11, %s753_s3 }
  0x38   :  { %p570_p12 = pnand %p568_p11, %p565_p10 }
  0x3a   :  { %573 = shalt.err (!%p570_p12)
}
  0x3b   :  { %s574_s16 = scalar_lea.vmem %s54_s7, 2048  ;;  %p579_p0 = scmp.lt.s32.totalorder %s54_s7, %s54_s7 }
  0x3c   :  { %p575_p13 = scmp.ne.s32.totalorder %s54_s7, %s574_s16  ;;  %p580_p1 = scmp.lt.s32.totalorder %s574_s16, %s574_s16 }
  0x3e   :  { %p581_p2 = por %p580_p1, %p579_p0 }
  0x40   :  { %p582_p3 = pnand %p581_p2, %p575_p13 }
  0x42   :  { %585 = shalt.err (!%p582_p3)
}
  0x43   :  { %59 = dma.hbm_to_vmem [thread:$0]  %s753_s3, 2048, %s54_s7, [#allocation9], %s617_s28, %s617_s28, %s618_s29  }
  0x44   :  { %608 = dma.done.wait [#allocation3], 128  }
  0x45   :  { %609 = vsyncadd [#allocation3], 4294967168 }
  0x46   :  { %610 = dma.done.wait [#allocation6], 1280  }
  0x47   :  { %611 = vsyncadd [#allocation6], 4294966016 }
  0x48   :  { %612 = dma.done.wait [#allocation9], 2048  }
  0x49   :  { %613 = vsyncadd [#allocation9], 4294965248  ;;  %v622_v0 = vmov 0.0|0.0   ;;  %vm623_vm0 = vmmov 0   ;;  %v624_v1 = vmov 0.0   ;;  %v75_v2 = vld [vmem:[#allocation5] sm:$0xff] }
  0x4a   :  { %449 = vmatprep.subr.bf16.mxu1 %v622_v0  ;;  %392 = vmatprep.mubr.msk.f32.mxu1 %vm623_vm0, %v624_v1  ;;  %v76_v3 = vld [vmem:[#allocation5 + $0x8] sm:$0xff]  ;;  %v157_v5 = vld [vmem:[#allocation7] sm:$0xff]  ;;  %v158_v6 = vld [vmem:[#allocation7 + $0x8] sm:$0xff]  ;;  %vm82_vm1 = vcmask 130048   ;;  %vm170_vm2 = vcmask 523264   ;;  %s625_s19 = smov [#allocation10]  }
  0x4b   :  { %464 = vmatprep.subr.bf16.mxu0 %v622_v0  ;;  %446 = vmatprep.mubr.msk.f32.mxu0 %vm623_vm0, %v624_v1  ;;  %v450_v4 = vpack.c.bf16 %v76_v3, %v75_v2  ;;  %v74_v7 = vld [vmem:[#allocation2] sm:$0xff]  ;;  %v453_v8 = vpack.c.bf16 %v158_v6, %v157_v5  ;;  %v159_v9 = vld [vmem:[#allocation7 + $0x10] sm:$0xff]  ;;  %v160_v10 = vld [vmem:[#allocation7 + $0x18] sm:$0xff]  ;;  %s343_s20 = sshll.u32 %s625_s19, 4  ;;  %s344_s20 = int_to_ptr.vmem [resolvable:$true] %s343_s20 }
  0x4c   :  { %v456_v11 = vpack.c.bf16 %v160_v10, %v159_v9  ;;  %v161_v12 = vld [vmem:[#allocation7 + $0x20] sm:$0xff]  ;;  %v162_v13 = vld [vmem:[#allocation7 + $0x28] sm:$0xff]  ;;  %v163_v15 = vld [vmem:[#allocation7 + $0x30] sm:$0xff]  ;;  %s586_s21 = scalar_lea.vmem %s344_s20, 128  ;;  %p591_p5 = scmp.lt.s32.totalorder %s344_s20, %s344_s20 }
  0x4d   :  { %451 = vmatpush3.bf16.msra.mxu1 %v450_v4  ;;  %v459_v14 = vpack.c.bf16 %v162_v13, %v161_v12  ;;  %v164_v16 = vld [vmem:[#allocation7 + $0x38] sm:$0xff]  ;;  %v245_v18 = vld [vmem:[#allocation8] sm:$0xff]  ;;  %v246_v19 = vld [vmem:[#allocation8 + $0x8] sm:$0xff]  ;;  %p587_p4 = scmp.ne.s32.totalorder %s344_s20, %s586_s21  ;;  %p592_p6 = scmp.lt.s32.totalorder %s586_s21, %s586_s21 }
  0x4e   :  { %452 = vmatprep.subr.bf16.mxu1 %v622_v0  ;;  %v462_v17 = vpack.c.bf16 %v164_v16, %v163_v15  ;;  %v247_v20 = vld [vmem:[#allocation8 + $0x10] sm:$0xff]  ;;  %v465_v21 = vpack.c.bf16 %v246_v19, %v245_v18  ;;  %v248_v22 = vld [vmem:[#allocation8 + $0x18] sm:$0xff]  ;;  %v249_v24 = vld [vmem:[#allocation8 + $0x20] sm:$0xff] }
  0x4f   :  { %v468_v23 = vpack.c.bf16 %v248_v22, %v247_v20  ;;  %v250_v25 = vld [vmem:[#allocation8 + $0x28] sm:$0xff]  ;;  %v251_v27 = vld [vmem:[#allocation8 + $0x30] sm:$0xff]  ;;  %v252_v28 = vld [vmem:[#allocation8 + $0x38] sm:$0xff]  ;;  %p593_p7 = por %p592_p6, %p591_p5 }
  0x50   :  { %393 = vmatmul.mubr.msk.f32.vlgmr.msra.gmra.mrb[0].mxu1 %vm82_vm1, %v74_v7  ;;  %466 = vmatpush3.bf16.msra.mxu0 %v465_v21  ;;  %v471_v26 = vpack.c.bf16 %v250_v25, %v249_v24  ;;  %v474_v29 = vpack.c.bf16 %v252_v28, %v251_v27  ;;  %v253_v30 = vld [vmem:[#allocation8 + $0x40] sm:$0xff]  ;;  %v254_v31 = vld [vmem:[#allocation8 + $0x48] sm:$0xff]  ;;  %v255_v33 = vld [vmem:[#allocation8 + $0x50] sm:$0xff] }
  0x51   :  { %454 = vmatpush3.bf16.msra.mxu1 %v453_v8  ;;  %411 = vmatprep.mubr.msk.f32.mxu1 %vm623_vm0, %v624_v1  ;;  %v477_v32 = vpack.c.bf16 %v254_v31, %v253_v30  ;;  %v256_v34 = vld [vmem:[#allocation8 + $0x58] sm:$0xff]  ;;  %v257_v36 = vld [vmem:[#allocation8 + $0x60] sm:$0xff]  ;;  %v258_v37 = vld [vmem:[#allocation8 + $0x68] sm:$0xff]  ;;  %p594_p8 = pnand %p593_p7, %p587_p4 }
  0x52   :  { %455 = vmatprep.subr.bf16.mxu1 %v622_v0  ;;  %467 = vmatprep.subr.bf16.mxu0 %v622_v0  ;;  %v480_v35 = vpack.c.bf16 %v256_v34, %v255_v33  ;;  %v483_v38 = vpack.c.bf16 %v258_v37, %v257_v36  ;;  %v354_v39 = vld [vmem:[%s754_s4] ss:$0 sm:$0xff]  ;;  %v259_v44 = vld [vmem:[#allocation8 + $0x70] sm:$0xff]  ;;  %v260_v45 = vld [vmem:[#allocation8 + $0x78] sm:$0xff] }
  0x53   :  { %v486_v46 = vpack.c.bf16 %v260_v45, %v259_v44  ;;  %v356_v47 = vld [vmem:[%s754_s4 + $0x1] ss:$0 sm:$0xff]  ;;  %v358_v52 = vld [vmem:[%s754_s4 + $0x2] ss:$0 sm:$0xff] }
  0x54   :  { %469 = vmatpush3.bf16.msra.mxu0 %v468_v23 }
  0x55   :  { %457 = vmatpush3.bf16.msra.mxu1 %v456_v11  ;;  %470 = vmatprep.subr.bf16.mxu0 %v622_v0 }
  0x56   :  { %458 = vmatprep.subr.bf16.mxu1 %v622_v0 }
  0x58   :  { %472 = vmatpush3.bf16.msra.mxu0 %v471_v26 }
  0x59   :  { %460 = vmatpush3.bf16.msra.mxu1 %v459_v14  ;;  %473 = vmatprep.subr.bf16.mxu0 %v622_v0 }
  0x5a   :  { %461 = vmatprep.subr.bf16.mxu1 %v622_v0 }
  0x5c   :  { %475 = vmatpush3.bf16.msra.mxu0 %v474_v29 }
  0x5d   :  { %463 = vmatpush3.bf16.msra.mxu1 %v462_v17  ;;  %476 = vmatprep.subr.bf16.mxu0 %v622_v0 }
  0x60   :  { %478 = vmatpush3.bf16.msra.mxu0 %v477_v32 }
  0x61   :  { %479 = vmatprep.subr.bf16.mxu0 %v622_v0 }
  0x64   :  { %481 = vmatpush3.bf16.msra.mxu0 %v480_v35 }
  0x65   :  { %482 = vmatprep.subr.bf16.mxu0 %v622_v0 }
  0x68   :  { %484 = vmatpush3.bf16.msra.mxu0 %v483_v38 }
  0x69   :  { %485 = vmatprep.subr.bf16.mxu0 %v622_v0 }
  0x6c   :  { %487 = vmatpush3.bf16.msra.mxu0 %v486_v46 }
 0x123   :  { %v152_v40 = vpop.f32.mrb[0].mxu1 }
 0x124   :  { %v153_v41 = vadd.f32 %v354_v39, %v152_v40  ;;  %v394_v42 = vpop.f32.mrb[1].mxu1 }
 0x126   :  { %v156_v43 = vmax.f32 %v153_v41, 0.0 }
 0x128   :  { %412 = vmatmul.mubr.msk.f32.vlgmr.msra.gmra.mrb[2].mxu1 %vm170_vm2, %v156_v43 }
 0x1fb   :  { %v240_v48 = vpop.f32.mrb[2].mxu1 }
 0x1fc   :  { %v241_v49 = vadd.f32 %v356_v47, %v240_v48  ;;  %v413_v50 = vpop.f32.mrb[3].mxu1 }
 0x1fe   :  { %v244_v51 = vmax.f32 %v241_v49, 0.0 }
 0x200   :  { %447 = vmatmul.mubr.f32.vlgmr.msra.gmra.mrb[0].mxu0 %v244_v51 }
 0x2d3   :  { %v332_v53 = vpop.f32.mrb[0].mxu0 }
 0x2d4   :  { %v333_v54 = vadd.f32 %v358_v52, %v332_v53  ;;  %v448_v55 = vpop.f32.mrb[1].mxu0 }
 0x2d6   :  { %336 = vst [vmem:[#allocation10] sm:$0xff] %v333_v54 }
 0x2d7   :  { %597 = shalt.err (!%p594_p8)
}
 0x2d8   :  { %s598_s24 = scalar_lea.hbm %s755_s5, 128 }
 0x2d9   :  { %p599_p9 = scmp.ne.s32.totalorder %s755_s5, %s598_s24  ;;  %p602_p10 = scmp.lt.u32.totalorder %s598_s24, %s755_s5 }
 0x2db   :  { %p604_p11 = pnand %p602_p10, %p599_p9 }
 0x2dd   :  { %607 = shalt.err (!%p604_p11)
}
 0x2de   :  { %346 = dma.vmem_to_hbm [thread:$0]  %s344_s20, 128, %s755_s5, [#allocation4]  }
 0x2df   :  { %614 = dma.done.wait [#allocation4], 128  }
 0x2e0   :  { %615 = vsyncadd [#allocation4], 4294967168 }
 0x2e1   :  { %350 = vsyncpa [#allocation3], 1 }
 0x2e2   :  { %351 = vsyncpa [#allocation6], 1 }
 0x2e3   :  { %352 = vsyncpa [#allocation9], 1 }
 0x2e4   :  { %353 = vsyncpa [#allocation4], 1 }

</bundles_post_ra>
